<compile_context>
chip_gen: v5e
topology: v5e:2x2
jax: 0.10.0
libtpu: 0.0.40
codegen_flags: <defaults>
</compile_context>

<pallas_src>
import math

import jax
import jax.numpy as jnp
from jax.experimental import pallas as pl
from jax.experimental.pallas import tpu as pltpu

# ---------------------------------------------------------------------------
# Problem sizes (small, consistent with the module: d_model divisible by heads)
# ---------------------------------------------------------------------------
B = 2          # batch
S = 8          # sequence length
D_MODEL = 32   # d_model
HEADS = 4
D_K = D_MODEL // HEADS


def mha_kernel(q_ref, k_ref, v_ref, mask_ref,
               wq_ref, bq_ref, wk_ref, bk_ref, wv_ref, bv_ref, wo_ref, bo_ref,
               out_ref):
    """One batch element per grid step, entirely in VMEM.

    q/k/v_ref : (1, S, D)   activations for this batch element
    mask_ref  : (S, S)      int mask (1 = keep, 0 = masked)
    w*_ref    : (D, D)      projection weights (x @ W layout)
    b*_ref    : (1, D)      projection biases
    out_ref   : (1, S, D)
    """
    q = q_ref[0]                                                  # (S, D)
    k = k_ref[0]
    v = v_ref[0]

    # --- Q/K/V projections: three dense MXU dots (f32 accumulation) ---------
    Q = jnp.dot(q, wq_ref[...], preferred_element_type=jnp.float32) + bq_ref[...]
    K = jnp.dot(k, wk_ref[...], preferred_element_type=jnp.float32) + bk_ref[...]
    V = jnp.dot(v, wv_ref[...], preferred_element_type=jnp.float32) + bv_ref[...]

    # --- Split heads and do both attention contractions batched over heads --
    Qh = Q.reshape(S, HEADS, D_K)                                 # (S, H, Dk)
    Kh = K.reshape(S, HEADS, D_K)
    Vh = V.reshape(S, HEADS, D_K)

    # scores[h, q, k] = Qh[q, h, :] . Kh[k, h, :]   (one batched dot_general)
    scores = jnp.einsum("qhd,khd->hqk", Qh, Kh,
                        preferred_element_type=jnp.float32)       # (H, S, S)
    scores = scores / math.sqrt(D_K)
    scores = jnp.where(mask_ref[...][None, :, :] == 0,
                       jnp.float32(-1e9), scores)

    # Numerically stable softmax along the key axis (exact division).
    scores = scores - jnp.max(scores, axis=-1, keepdims=True)
    p = jnp.exp(scores)
    p = p / jnp.sum(p, axis=-1, keepdims=True)                    # (H, S, S)

    # ctx[q, h, :] = sum_k p[h, q, k] * Vh[k, h, :]  -> already (S, H, Dk),
    # so the head "concat" is just a contiguous reshape to (S, D).
    ctx = jnp.einsum("hqk,khd->qhd", p, Vh,
                     preferred_element_type=jnp.float32)          # (S, H, Dk)
    ctx = ctx.reshape(S, D_MODEL)                                 # (S, D)

    # --- Output projection: single (S, D) @ (D, D) dot ----------------------
    out = jnp.dot(ctx, wo_ref[...], preferred_element_type=jnp.float32) + bo_ref[...]
    out_ref[0] = out.astype(out_ref.dtype)


def multi_head_attention(q, k, v, mask, params):
    """q/k/v: (B, S, D) f32; mask: (S, S) int (1 = keep); params: dict with
    wq/wk/wv/wo of shape (D, D) (x @ W layout) and bq/bk/bv/bo of shape (1, D)."""
    d = D_MODEL

    act_spec = pl.BlockSpec((1, S, d), lambda b: (b, 0, 0))
    w_spec = pl.BlockSpec((d, d), lambda b: (0, 0))
    b_spec = pl.BlockSpec((1, d), lambda b: (0, 0))
    mask_spec = pl.BlockSpec((S, S), lambda b: (0, 0))

    out = pl.pallas_call(
        mha_kernel,
        out_shape=jax.ShapeDtypeStruct((B, S, d), q.dtype),
        grid=(B,),
        in_specs=[act_spec, act_spec, act_spec, mask_spec,
                  w_spec, b_spec, w_spec, b_spec, w_spec, b_spec, w_spec, b_spec],
        out_specs=act_spec,
        compiler_params=pltpu.CompilerParams(
            dimension_semantics=("parallel",)),
    )(q, k, v, mask,
      params["wq"], params["bq"], params["wk"], params["bk"],
      params["wv"], params["bv"], params["wo"], params["bo"])

    return out


# ---------------------------------------------------------------------------
# Pure-JAX reference (mirrors the PyTorch forward exactly, dropout p=0)
# ---------------------------------------------------------------------------
def reference_mha(q, k, v, mask, params):
    def lin(x, w, b):
        return x @ w + b

    Q = lin(q, params["wq"], params["bq"])
    K = lin(k, params["wk"], params["bk"])
    V = lin(v, params["wv"], params["bv"])

    def split(x):  # (B, S, D) -> (B, H, S, D_K)
        return x.reshape(B, S, HEADS, D_K).transpose(0, 2, 1, 3)

    Qh, Kh, Vh = split(Q), split(K), split(V)
    scores = jnp.einsum("bhqd,bhkd->bhqk", Qh, Kh) / math.sqrt(D_K)
    scores = jnp.where(mask[None, None, :, :] == 0, -1e9, scores)
    probs = jax.nn.softmax(scores, axis=-1)
    ctx = jnp.einsum("bhqk,bhkd->bhqd", probs, Vh)
    ctx = ctx.transpose(0, 2, 1, 3).reshape(B, S, D_MODEL)
    return lin(ctx, params["wo"], params["bo"])


if __name__ == "__main__":
    key = jax.random.PRNGKey(0)
    keys = jax.random.split(key, 12)

    # Deterministic synthetic parameters. nn.Linear is y = x @ W^T + b; here we
    # directly create the (D_in, D_out) matrix used as x @ W.
    wscale = 1.0 / math.sqrt(D_MODEL)
    params = {
        "wq": jax.random.normal(keys[0], (D_MODEL, D_MODEL), jnp.float32) * wscale,
        "bq": jax.random.normal(keys[1], (1, D_MODEL), jnp.float32) * 0.01,
        "wk": jax.random.normal(keys[2], (D_MODEL, D_MODEL), jnp.float32) * wscale,
        "bk": jax.random.normal(keys[3], (1, D_MODEL), jnp.float32) * 0.01,
        "wv": jax.random.normal(keys[4], (D_MODEL, D_MODEL), jnp.float32) * wscale,
        "bv": jax.random.normal(keys[5], (1, D_MODEL), jnp.float32) * 0.01,
        "wo": jax.random.normal(keys[6], (D_MODEL, D_MODEL), jnp.float32) * wscale,
        "bo": jax.random.normal(keys[7], (1, D_MODEL), jnp.float32) * 0.01,
    }

    q = jax.random.normal(keys[8], (B, S, D_MODEL), jnp.float32)
    k = jax.random.normal(keys[9], (B, S, D_MODEL), jnp.float32)
    v = jax.random.normal(keys[10], (B, S, D_MODEL), jnp.float32)

    # Causal mask (1 = keep, 0 = masked), broadcast over batch and heads.
    mask = jnp.tril(jnp.ones((S, S), jnp.int32))

    out = multi_head_attention(q, k, v, mask, params)
    out = jax.block_until_ready(out)

    ref = reference_mha(q, k, v, mask, params)
    assert out.shape == (B, S, D_MODEL)
    assert jnp.allclose(out, ref, atol=1e-4, rtol=1e-4), "mismatch vs reference"

    print("KERNEL_OK")
</pallas_src>

<mosaic_0001>
module attributes {stable_mosaic.version = 11 : i64} {
  func.func @mha_kernel(%arg0: i32, %arg1: memref<1x8x32xf32, #tpu.memory_space<vmem>>, %arg2: memref<1x8x32xf32, #tpu.memory_space<vmem>>, %arg3: memref<1x8x32xf32, #tpu.memory_space<vmem>>, %arg4: memref<8x8xi32, #tpu.memory_space<vmem>>, %arg5: memref<32x32xf32, #tpu.memory_space<vmem>>, %arg6: memref<1x32xf32, #tpu.memory_space<vmem>>, %arg7: memref<32x32xf32, #tpu.memory_space<vmem>>, %arg8: memref<1x32xf32, #tpu.memory_space<vmem>>, %arg9: memref<32x32xf32, #tpu.memory_space<vmem>>, %arg10: memref<1x32xf32, #tpu.memory_space<vmem>>, %arg11: memref<32x32xf32, #tpu.memory_space<vmem>>, %arg12: memref<1x32xf32, #tpu.memory_space<vmem>>, %arg13: memref<1x8x32xf32, #tpu.memory_space<vmem>>) attributes {dimension_semantics = [#tpu.dimension_semantics<parallel>], iteration_bounds = array<i64: 2>, scalar_prefetch = 0 : i64, scratch_operands = 0 : i64, tpu.core_type = #tpu.core_type<tc>, window_params = [{transform_indices = @transform_0, window_bounds = array<i64: 1, 8, 32>}, {transform_indices = @transform_1, window_bounds = array<i64: 1, 8, 32>}, {transform_indices = @transform_2, window_bounds = array<i64: 1, 8, 32>}, {pipeline_mode = #tpu.pipeline_mode<synchronous>, transform_indices = @transform_3, window_bounds = array<i64: 8, 8>}, {pipeline_mode = #tpu.pipeline_mode<synchronous>, transform_indices = @transform_4, window_bounds = array<i64: 32, 32>}, {pipeline_mode = #tpu.pipeline_mode<synchronous>, transform_indices = @transform_5, window_bounds = array<i64: 1, 32>}, {pipeline_mode = #tpu.pipeline_mode<synchronous>, transform_indices = @transform_6, window_bounds = array<i64: 32, 32>}, {pipeline_mode = #tpu.pipeline_mode<synchronous>, transform_indices = @transform_7, window_bounds = array<i64: 1, 32>}, {pipeline_mode = #tpu.pipeline_mode<synchronous>, transform_indices = @transform_8, window_bounds = array<i64: 32, 32>}, {pipeline_mode = #tpu.pipeline_mode<synchronous>, transform_indices = @transform_9, window_bounds = array<i64: 1, 32>}, {pipeline_mode = #tpu.pipeline_mode<synchronous>, transform_indices = @transform_10, window_bounds = array<i64: 32, 32>}, {pipeline_mode = #tpu.pipeline_mode<synchronous>, transform_indices = @transform_11, window_bounds = array<i64: 1, 32>}, {transform_indices = @transform_12, window_bounds = array<i64: 1, 8, 32>}]} {
    %c0 = arith.constant 0 : index
    %c0_0 = arith.constant 0 : index
    %c0_1 = arith.constant 0 : index
    %0 = vector.load %arg1[%c0, %c0_0, %c0_1] : memref<1x8x32xf32, #tpu.memory_space<vmem>>, vector<1x8x32xf32>
    %1 = vector.shape_cast %0 : vector<1x8x32xf32> to vector<8x32xf32>
    %c0_2 = arith.constant 0 : index
    %c0_3 = arith.constant 0 : index
    %c0_4 = arith.constant 0 : index
    %2 = vector.load %arg2[%c0_2, %c0_3, %c0_4] : memref<1x8x32xf32, #tpu.memory_space<vmem>>, vector<1x8x32xf32>
    %3 = vector.shape_cast %2 : vector<1x8x32xf32> to vector<8x32xf32>
    %c0_5 = arith.constant 0 : index
    %c0_6 = arith.constant 0 : index
    %c0_7 = arith.constant 0 : index
    %4 = vector.load %arg3[%c0_5, %c0_6, %c0_7] : memref<1x8x32xf32, #tpu.memory_space<vmem>>, vector<1x8x32xf32>
    %5 = vector.shape_cast %4 : vector<1x8x32xf32> to vector<8x32xf32>
    %c0_8 = arith.constant 0 : index
    %c0_9 = arith.constant 0 : index
    %6 = vector.load %arg5[%c0_8, %c0_9] : memref<32x32xf32, #tpu.memory_space<vmem>>, vector<32x32xf32>
    %cst = arith.constant dense<0.000000e+00> : vector<8x32xf32>
    %7 = tpu.matmul %1, %6, %cst {dimension_numbers = #tpu.dot_dimension_numbers<[1], [0], [0], [1], [0, 0, 1, 1], [], []>} : vector<8x32xf32>, vector<32x32xf32>, vector<8x32xf32> -> vector<8x32xf32>
    %c0_10 = arith.constant 0 : index
    %c0_11 = arith.constant 0 : index
    %8 = vector.load %arg6[%c0_10, %c0_11] : memref<1x32xf32, #tpu.memory_space<vmem>>, vector<1x32xf32>
    %9 = vector.broadcast %8 : vector<1x32xf32> to vector<8x32xf32>
    %10 = arith.addf %7, %9 : vector<8x32xf32>
    %c0_12 = arith.constant 0 : index
    %c0_13 = arith.constant 0 : index
    %11 = vector.load %arg7[%c0_12, %c0_13] : memref<32x32xf32, #tpu.memory_space<vmem>>, vector<32x32xf32>
    %cst_14 = arith.constant dense<0.000000e+00> : vector<8x32xf32>
    %12 = tpu.matmul %3, %11, %cst_14 {dimension_numbers = #tpu.dot_dimension_numbers<[1], [0], [0], [1], [0, 0, 1, 1], [], []>} : vector<8x32xf32>, vector<32x32xf32>, vector<8x32xf32> -> vector<8x32xf32>
    %c0_15 = arith.constant 0 : index
    %c0_16 = arith.constant 0 : index
    %13 = vector.load %arg8[%c0_15, %c0_16] : memref<1x32xf32, #tpu.memory_space<vmem>>, vector<1x32xf32>
    %14 = vector.broadcast %13 : vector<1x32xf32> to vector<8x32xf32>
    %15 = arith.addf %12, %14 : vector<8x32xf32>
    %c0_17 = arith.constant 0 : index
    %c0_18 = arith.constant 0 : index
    %16 = vector.load %arg9[%c0_17, %c0_18] : memref<32x32xf32, #tpu.memory_space<vmem>>, vector<32x32xf32>
    %cst_19 = arith.constant dense<0.000000e+00> : vector<8x32xf32>
    %17 = tpu.matmul %5, %16, %cst_19 {dimension_numbers = #tpu.dot_dimension_numbers<[1], [0], [0], [1], [0, 0, 1, 1], [], []>} : vector<8x32xf32>, vector<32x32xf32>, vector<8x32xf32> -> vector<8x32xf32>
    %c0_20 = arith.constant 0 : index
    %c0_21 = arith.constant 0 : index
    %18 = vector.load %arg10[%c0_20, %c0_21] : memref<1x32xf32, #tpu.memory_space<vmem>>, vector<1x32xf32>
    %19 = vector.broadcast %18 : vector<1x32xf32> to vector<8x32xf32>
    %20 = arith.addf %17, %19 : vector<8x32xf32>
    %21 = vector.shape_cast %10 : vector<8x32xf32> to vector<8x4x8xf32>
    %22 = vector.shape_cast %15 : vector<8x32xf32> to vector<8x4x8xf32>
    %23 = vector.shape_cast %20 : vector<8x32xf32> to vector<8x4x8xf32>
    "tpu.trace_start"() <{level = 10 : i32, message = "qhd,khd->hqk"}> : () -> ()
    %cst_22 = arith.constant dense<0.000000e+00> : vector<4x8x8xf32>
    %24 = tpu.matmul %21, %22, %cst_22 {dimension_numbers = #tpu.dot_dimension_numbers<[2], [2], [0], [0], [0, 1, 0, 0, 1, 0], [1], [1]>} : vector<8x4x8xf32>, vector<8x4x8xf32>, vector<4x8x8xf32> -> vector<4x8x8xf32>
    "tpu.trace_stop"() : () -> ()
    %cst_23 = arith.constant 2.82842708 : f32
    %25 = vector.broadcast %cst_23 : f32 to vector<4x8x8xf32>
    %26 = arith.divf %24, %25 : vector<4x8x8xf32>
    %c0_24 = arith.constant 0 : index
    %c0_25 = arith.constant 0 : index
    %27 = vector.load %arg4[%c0_24, %c0_25] : memref<8x8xi32, #tpu.memory_space<vmem>>, vector<8x8xi32>
    %28 = vector.shape_cast %27 : vector<8x8xi32> to vector<1x8x8xi32>
    %c0_i32 = arith.constant 0 : i32
    %29 = vector.broadcast %c0_i32 : i32 to vector<1x8x8xi32>
    %30 = arith.cmpi eq, %28, %29 : vector<1x8x8xi32>
    %cst_26 = arith.constant -1.000000e+09 : f32
    %31 = vector.shape_cast %30 : vector<1x8x8xi1> to vector<1x8x8xi1>
    %32 = vector.broadcast %31 : vector<1x8x8xi1> to vector<4x8x8xi1>
    %33 = vector.broadcast %cst_26 : f32 to vector<4x8x8xf32>
    %34 = arith.select %32, %33, %26 : vector<4x8x8xi1>, vector<4x8x8xf32>
    %cst_27 = arith.constant dense<0xFF800000> : vector<4x8xf32>
    %35 = vector.multi_reduction <maximumf>, %34, %cst_27 [2] : vector<4x8x8xf32> to vector<4x8xf32>
    %36 = vector.shape_cast %35 : vector<4x8xf32> to vector<4x8x1xf32>
    %37 = vector.broadcast %36 : vector<4x8x1xf32> to vector<4x8x8xf32>
    %38 = arith.subf %34, %37 : vector<4x8x8xf32>
    %39 = math.exp %38 : vector<4x8x8xf32>
    %cst_28 = arith.constant dense<0.000000e+00> : vector<4x8xf32>
    %40 = vector.multi_reduction <add>, %39, %cst_28 [2] : vector<4x8x8xf32> to vector<4x8xf32>
    %41 = vector.shape_cast %40 : vector<4x8xf32> to vector<4x8x1xf32>
    %42 = vector.broadcast %41 : vector<4x8x1xf32> to vector<4x8x8xf32>
    %43 = arith.divf %39, %42 : vector<4x8x8xf32>
    "tpu.trace_start"() <{level = 10 : i32, message = "hqk,khd->qhd"}> : () -> ()
    %cst_29 = arith.constant dense<0.000000e+00> : vector<4x8x8xf32>
    %44 = tpu.matmul %23, %43, %cst_29 {dimension_numbers = #tpu.dot_dimension_numbers<[0], [2], [2], [1], [0, 1, 0, 2, 1, 1], [1], [0]>} : vector<8x4x8xf32>, vector<4x8x8xf32>, vector<4x8x8xf32> -> vector<4x8x8xf32>
    %45 = tpu.transpose %44, [2, 0, 1] : vector<4x8x8xf32> -> vector<8x4x8xf32>
    "tpu.trace_stop"() : () -> ()
    %46 = vector.shape_cast %45 : vector<8x4x8xf32> to vector<8x32xf32>
    %c0_30 = arith.constant 0 : index
    %c0_31 = arith.constant 0 : index
    %47 = vector.load %arg11[%c0_30, %c0_31] : memref<32x32xf32, #tpu.memory_space<vmem>>, vector<32x32xf32>
    %cst_32 = arith.constant dense<0.000000e+00> : vector<8x32xf32>
    %48 = tpu.matmul %46, %47, %cst_32 {dimension_numbers = #tpu.dot_dimension_numbers<[1], [0], [0], [1], [0, 0, 1, 1], [], []>} : vector<8x32xf32>, vector<32x32xf32>, vector<8x32xf32> -> vector<8x32xf32>
    %c0_33 = arith.constant 0 : index
    %c0_34 = arith.constant 0 : index
    %49 = vector.load %arg12[%c0_33, %c0_34] : memref<1x32xf32, #tpu.memory_space<vmem>>, vector<1x32xf32>
    %50 = vector.broadcast %49 : vector<1x32xf32> to vector<8x32xf32>
    %51 = arith.addf %48, %50 : vector<8x32xf32>
    %c0_35 = arith.constant 0 : index
    %c0_36 = arith.constant 0 : index
    %c0_37 = arith.constant 0 : index
    %52 = vector.load %arg13[%c0_35, %c0_36, %c0_37] : memref<1x8x32xf32, #tpu.memory_space<vmem>>, vector<1x8x32xf32>
    %53 = vector.shape_cast %52 : vector<1x8x32xf32> to vector<8x32xf32>
    %54 = vector.shape_cast %51 : vector<8x32xf32> to vector<1x8x32xf32>
    tpu.vector_store %arg13[%c0_35, %c0_36, %c0_37], %54 {strides = array<i32>} : memref<1x8x32xf32, #tpu.memory_space<vmem>>, vector<1x8x32xf32>,
    return
  }
  func.func @transform_0(%arg0: i32) -> (i32, i32, i32) {
    %c0_i32 = arith.constant 0 : i32
    %c0_i32_0 = arith.constant 0 : i32
    %c0_i32_1 = arith.constant 0 : i32
    return %arg0, %c0_i32, %c0_i32_0 : i32, i32, i32
  }
  func.func @transform_1(%arg0: i32) -> (i32, i32, i32) {
    %c0_i32 = arith.constant 0 : i32
    %c0_i32_0 = arith.constant 0 : i32
    %c0_i32_1 = arith.constant 0 : i32
    return %arg0, %c0_i32, %c0_i32_0 : i32, i32, i32
  }
  func.func @transform_2(%arg0: i32) -> (i32, i32, i32) {
    %c0_i32 = arith.constant 0 : i32
    %c0_i32_0 = arith.constant 0 : i32
    %c0_i32_1 = arith.constant 0 : i32
    return %arg0, %c0_i32, %c0_i32_0 : i32, i32, i32
  }
  func.func @transform_3(%arg0: i32) -> (i32, i32) {
    %c0_i32 = arith.constant 0 : i32
    %c0_i32_0 = arith.constant 0 : i32
    %c0_i32_1 = arith.constant 0 : i32
    return %c0_i32, %c0_i32_0 : i32, i32
  }
  func.func @transform_4(%arg0: i32) -> (i32, i32) {
    %c0_i32 = arith.constant 0 : i32
    %c0_i32_0 = arith.constant 0 : i32
    %c0_i32_1 = arith.constant 0 : i32
    return %c0_i32, %c0_i32_0 : i32, i32
  }
  func.func @transform_5(%arg0: i32) -> (i32, i32) {
    %c0_i32 = arith.constant 0 : i32
    %c0_i32_0 = arith.constant 0 : i32
    %c0_i32_1 = arith.constant 0 : i32
    return %c0_i32, %c0_i32_0 : i32, i32
  }
  func.func @transform_6(%arg0: i32) -> (i32, i32) {
    %c0_i32 = arith.constant 0 : i32
    %c0_i32_0 = arith.constant 0 : i32
    %c0_i32_1 = arith.constant 0 : i32
    return %c0_i32, %c0_i32_0 : i32, i32
  }
  func.func @transform_7(%arg0: i32) -> (i32, i32) {
    %c0_i32 = arith.constant 0 : i32
    %c0_i32_0 = arith.constant 0 : i32
    %c0_i32_1 = arith.constant 0 : i32
    return %c0_i32, %c0_i32_0 : i32, i32
  }
  func.func @transform_8(%arg0: i32) -> (i32, i32) {
    %c0_i32 = arith.constant 0 : i32
    %c0_i32_0 = arith.constant 0 : i32
    %c0_i32_1 = arith.constant 0 : i32
    return %c0_i32, %c0_i32_0 : i32, i32
  }
  func.func @transform_9(%arg0: i32) -> (i32, i32) {
    %c0_i32 = arith.constant 0 : i32
    %c0_i32_0 = arith.constant 0 : i32
    %c0_i32_1 = arith.constant 0 : i32
    return %c0_i32, %c0_i32_0 : i32, i32
  }
  func.func @transform_10(%arg0: i32) -> (i32, i32) {
    %c0_i32 = arith.constant 0 : i32
    %c0_i32_0 = arith.constant 0 : i32
    %c0_i32_1 = arith.constant 0 : i32
    return %c0_i32, %c0_i32_0 : i32, i32
  }
  func.func @transform_11(%arg0: i32) -> (i32, i32) {
    %c0_i32 = arith.constant 0 : i32
    %c0_i32_0 = arith.constant 0 : i32
    %c0_i32_1 = arith.constant 0 : i32
    return %c0_i32, %c0_i32_0 : i32, i32
  }
  func.func @transform_12(%arg0: i32) -> (i32, i32, i32) {
    %c0_i32 = arith.constant 0 : i32
    %c0_i32_0 = arith.constant 0 : i32
    %c0_i32_1 = arith.constant 0 : i32
    return %arg0, %c0_i32, %c0_i32_0 : i32, i32, i32
  }
}

</mosaic_0001>

<bundles_post_ra>
// kernel: tpu_custom_call.1
= control target key start
LH: loop header
LB: loop body
LE: loop exit
PB: predicated region body
PF: predicated region fallthrough
CT: control target
= control target key end

     0   :  { %s2671_s0 = inlined_call_operand.hbm [shape: f32[2,8,32], index: 0, kind: input, shape index: {}]   ;;  %s2672_s1 = inlined_call_operand.hbm [shape: f32[2,8,32], index: 1, kind: input, shape index: {}]   ;;  %s2673_s2 = inlined_call_operand.hbm [shape: f32[2,8,32], index: 2, kind: input, shape index: {}]   ;;  %s2674_s3 = inlined_call_operand.hbm [shape: s32[8,8], index: 3, kind: input, shape index: {}]   ;;  %s2675_s4 = inlined_call_operand.hbm [shape: f32[32,32], index: 4, kind: input, shape index: {}]   ;;  %s2676_s5 = inlined_call_operand.vmem [shape: f32[1,32], index: 5, kind: input, shape index: {}]   ;;  %s2677_s6 = inlined_call_operand.hbm [shape: f32[32,32], index: 6, kind: input, shape index: {}]   ;;  %s2678_s7 = inlined_call_operand.vmem [shape: f32[1,32], index: 7, kind: input, shape index: {}]   ;;  %s2679_s8 = inlined_call_operand.hbm [shape: f32[32,32], index: 8, kind: input, shape index: {}]   ;;  %s2680_s9 = inlined_call_operand.vmem [shape: f32[1,32], index: 9, kind: input, shape index: {}]   ;;  %s2681_s10 = inlined_call_operand.hbm [shape: f32[32,32], index: 10, kind: input, shape index: {}]   ;;  %s2682_s11 = inlined_call_operand.vmem [shape: f32[1,32], index: 11, kind: input, shape index: {}]   ;;  %s2683_s12 = inlined_call_operand.hbm [shape: f32[2,8,32], index: 12, kind: output, shape index: {}]  }
   0x1   :  { %2698 = sst [smem:[#allocation29_spill]] %s2672_s1 }
   0x2   :  { %2699 = sst [smem:[#allocation30_spill]] %s2674_s3 }
   0x3   :  { %2700 = sst [smem:[#allocation31_spill]] %s2675_s4 }
   0x4   :  { %2701 = sst [smem:[#allocation32_spill]] %s2677_s6 }
   0x5   :  { %2702 = sst [smem:[#allocation33_spill]] %s2682_s11 }
   0x6   :  { %2703 = sst [smem:[#allocation34_spill]] %s2683_s12 }
   0x7   :  { %17 = vsyncpa [#allocation3], 0 }
   0x8   :  { %19 = vsyncpa [#allocation3 + $0x1], 0 }
   0x9   :  { %20 = vsyncpa [#allocation6], 0 }
   0xa   :  { %22 = vsyncpa [#allocation6 + $0x1], 0 }
   0xb   :  { %23 = vsyncpa [#allocation9], 0 }
   0xc   :  { %24 = vsyncpa [#allocation12], 0 }
   0xd   :  { %25 = vsyncpa [#allocation15], 0 }
   0xe   :  { %26 = vsyncpa [#allocation4], 0 }
   0xf   :  { %28 = vsyncpa [#allocation4 + $0x1], 0  ;;  %s2337_s21 = smov 0   ;;  %s2339_s22 = smov 0  }
  0x10   :  { %s2341_s23 = smov 0   ;;  %s2343_s24 = smov 0  }
  0x11 LB: > { %2704 = sst [smem:[#allocation23_spill]] %s2242_s21  ;;  %s2361_s28 = sadd.s32 4294967295, %s2254_s24   ;;  %s2254_s24 = sphi %s2343_s24, %s2736_s24   ;;  %s2250_s23 = sphi %s2341_s23, %s2740_s23   ;;  %s2246_s22 = sphi %s2339_s22, %s2739_s22   ;;  %s2242_s21 = sphi %s2337_s21, %s2738_s21  }
  0x12   : > { %2705 = sst [smem:[#allocation24_spill]] %s2254_s24  ;;  %p1741_p0 = scmp.ge.s32.totalorder %s2254_s24, 1 }
  0x13   : > { %s2706_s3 = sld [smem:[#allocation30_spill]]  ;;  %p2694_p1 = scmp.eq.s32.totalorder %s2361_s28, 0 }
  0x14   : > { %p332_p2 = scmp.lt.s32.totalorder %s2254_s24, 3  ;;  %s2256_s30 = smov [#allocation8]  }
  0x15   : > { %s346_s13 = sshll.u32 %s2256_s30, 4  ;;  %s2708_s6 = sld [smem:[#allocation32_spill]]  ;;  %s347_s13 = int_to_ptr.vmem [resolvable:$true] %s346_s13 }
  0x16   : > { %p2366_p3 = pnand %p1741_p0, %p332_p2  ;;  %s2257_s18 = smov [#allocation11]  }
  0x17   : > { %s374_s19 = sshll.u32 %s2257_s18, 4  ;;  %s2684_s20 = smov 128   ;;  %s375_s19 = int_to_ptr.vmem [resolvable:$true] %s374_s19 }
  0x18   : > { %p1812_p5 = pneg %p2366_p3  ;;  %s2686_s25 = smov 8  }
  0x19   : > { %s344_s27 = sshll.u32 %s2706_s3, 4  ;;  %s1740_s26 = sadd.s32 4294967294, %s2254_s24   ;;  %s345_s27 = int_to_ptr.hbm [resolvable:$true] %s344_s27 }
  0x1a   : > { %p2378_p6 = pnand %p1812_p5, %p2694_p1  ;;  %s2391_s30 = sadd.s32 1, %s2254_s24  }
  0x1b   : > { %s372_s16 = sshll.u32 %s2708_s6, 4  ;;  %2710 = sst [smem:[#allocation25_spill]] %s2391_s30  ;;  %s373_s16 = int_to_ptr.hbm [resolvable:$true] %s372_s16 }
  0x1c   : > { %1815 = dma.hbm_to_vmem [thread:$0]  (!%p2378_p6), %s345_s27, 128, %s347_s13, [#allocation9]  }
  0x1d   : > { %1821 = dma.hbm_to_vmem [thread:$0]  (!%p2378_p6), %s373_s16, 512, %s375_s19, [#allocation12], %s2684_s20, %s2684_s20, %s2686_s25  }
  0x1e   : > { %s38_s14 = ssub.s32 %s2254_s24, %s2391_s30  ;;  %s41_s15 = sadd.s32 1, %s2250_s23 }
  0x1f   : > { %p39_p7 = scmp.eq.s32.totalorder %s38_s14, 0  ;;  %p48_p8 = scmp.ne.s32.totalorder %s2250_s23, %s2246_s22 }
  0x20   : > { %p49_p9 = scmp.eq.s32.totalorder %s2254_s24, 0  ;;  %p54_p10 = scmp.ne.s32.totalorder %s2246_s22, %s2242_s21 }
  0x21   : > { %s2402_s27 = scalar_select %p39_p7, %s2250_s23, %s41_s15  }
  0x22   : > { %p50_p11 = por %p49_p9, %p48_p8  ;;  %p2406_p12 = por %p2694_p1, %p54_p10 }
  0x23   : > { %2711 = sst [smem:[#allocation26_spill]] %s2402_s27  ;;  %p319_p13 = scmp.eq.s32.totalorder %s2361_s28, 1 }
  0x24   : > { %p325_p0 = scmp.eq.s32.totalorder %s1740_s26, 1  ;;  %p1847_p2 = scmp.lt.s32.totalorder %s2254_s24, 2 }
  0x25   : > { %s2691_s16 = sand.u32 1, %s2250_s23   ;;  %p2413_p5 = por %p319_p13, %p48_p8 }
  0x26   : > { %p2417_p4 = por %p325_p0, %p54_p10  ;;  %s2423_s14 = sshll.u32 %s2691_s16, 3 }
  0x27   : > { %s2713_s18 = scalar_select %p2413_p5, 1, 0 }
  0x28   : > { %s2715_s19 = scalar_select %p2417_p4, 1, 0 }
  0x29   : > { %2714 = sst [smem:[#allocation27_spill]] %s2713_s18  ;;  %s2426_s15 = sshll.u32 %s2254_s24, 3 }
  0x2a   : > { %2716 = sst [smem:[#allocation28_spill]] %s2715_s19  ;;  %p2428_p7 = pnand %p1847_p2, %p50_p11 }
  0x2b   : > { %s444_s26 = sand.u32 1, %s2254_s24   ;;  %s2718_s1 = sld [smem:[#allocation29_spill]] }
  0x2c   : > { %s448_s30 = scalar_lea.vmem [#allocation5], %s2423_s14  ;;  %s2438_s16 = scalar_lea.sflag [#allocation6], %s444_s26 }
  0x2d   : > { %s456_s19 = sshll.u32 %s448_s30, 4  ;;  %p1996_p9 = pneg %p2428_p7  ;;  %s457_s19 = int_to_ptr.vmem [resolvable:$true] %s456_s19 }
  0x31   : > { %s452_s6 = scalar_lea.hbm %s2718_s1, %s2426_s15 }
  0x32   : > { %s454_s27 = sshll.u32 %s452_s6, 4  ;;  %s1999_s6 = scalar_lea.hbm %s2718_s1, 16  ;;  %s455_s27 = int_to_ptr.hbm [resolvable:$true] %s454_s27 }
  0x33   : > { %s1992_s21 = sshra.s32 %s455_s27, 4  ;;  %s1993_s21 = int_to_ptr.hbm [resolvable:$true] %s1992_s21 }
  0x34   : > { %s1994_s11 = scalar_lea.hbm %s1993_s21, 8  ;;  %p2000_p13 = scmp.lt.s32.totalorder %s1993_s21, %s2718_s1 }
  0x35   : > { %p1995_p8 = scmp.ne.s32.totalorder %s1993_s21, %s1994_s11  ;;  %p2001_p0 = scmp.lt.s32.totalorder %s1999_s6, %s1994_s11 }
  0x37   : > { %p1997_p10 = pnand %p1996_p9, %p1995_p8  ;;  %p2002_p2 = por %p2001_p0, %p2000_p13 }
  0x39   : > { %p1998_p11 = pneg %p1997_p10 }
  0x3b   : > { %p2003_p1 = pnand %p2002_p2, %p1998_p11 }
  0x3d   : > { %2006 = shalt.err (!%p2003_p1)
}
  0x3e   : > { %1834 = dma.hbm_to_vmem [thread:$0]  (!%p2428_p7), %s455_s27, 128, %s457_s19, %s2438_s16  }
  0x3f   : > { %s2719_s4 = sld [smem:[#allocation31_spill]]  ;;  %s2260_s24 = smov [#allocation10]  }
  0x40   : > { %s357_s3 = sshll.u32 %s2260_s24, 4  ;;  %s389_s6 = sshll.u32 %s2679_s8, 4  ;;  %s358_s3 = int_to_ptr.vmem [resolvable:$true] %s357_s3  ;;  %s390_s6 = int_to_ptr.hbm [resolvable:$true] %s389_s6 }
  0x41   : > { %s2720_s25 = smov 8   ;;  %s2721_s30 = smov 128  }
  0x42   : > { %s2261_s27 = smov [#allocation13]   ;;  %s406_s1 = sshll.u32 %s2681_s10, 4  ;;  %s407_s1 = int_to_ptr.hbm [resolvable:$true] %s406_s1 }
  0x43   : > { %s391_s18 = sshll.u32 %s2261_s27, 4  ;;  %s2262_s24 = smov [#allocation14]   ;;  %s392_s18 = int_to_ptr.vmem [resolvable:$true] %s391_s18 }
  0x44   : > { %1824 = dma.hbm_to_vmem [thread:$0]  (!%p2378_p6), %s390_s6, 512, %s392_s18, [#allocation12], %s2721_s30, %s2721_s30, %s2720_s25  }
  0x45   : > { %s355_s12 = sshll.u32 %s2719_s4, 4  ;;  %s408_s11 = sshll.u32 %s2262_s24, 4  ;;  %s356_s12 = int_to_ptr.hbm [resolvable:$true] %s355_s12  ;;  %s409_s11 = int_to_ptr.vmem [resolvable:$true] %s408_s11 }
  0x46   : > { %1818 = dma.hbm_to_vmem [thread:$0]  (!%p2378_p6), %s356_s12, 512, %s358_s3, [#allocation9], %s2721_s30, %s2721_s30, %s2720_s25  }
  0x47   : > { %s433_s21 = scalar_lea.hbm %s2671_s0, %s2426_s15  ;;  %s429_s19 = scalar_lea.vmem [#allocation2], %s2423_s14 }
  0x48   : > { %1827 = dma.hbm_to_vmem [thread:$0]  (!%p2378_p6), %s407_s1, 512, %s409_s11, [#allocation15], %s2721_s30, %s2721_s30, %s2720_s25  }
  0x49   : > { %s435_s27 = sshll.u32 %s433_s21, 4  ;;  %s437_s26 = sshll.u32 %s429_s19, 4  ;;  %s436_s27 = int_to_ptr.hbm [resolvable:$true] %s435_s27  ;;  %s438_s26 = int_to_ptr.vmem [resolvable:$true] %s437_s26 }
  0x4a   : > { %s2722_s4 = sand.u32 1, %s2250_s23   ;;  %s2112_s18 = sshra.s32 %s436_s27, 4  ;;  %s2113_s18 = int_to_ptr.hbm [resolvable:$true] %s2112_s18 }
  0x4b   : > { %s426_s6 = scalar_lea.sflag [#allocation3], %s2722_s4  ;;  %s2114_s24 = scalar_lea.hbm %s2113_s18, 8 }
  0x4c   : > { %p2115_p1 = scmp.ne.s32.totalorder %s2113_s18, %s2114_s24  ;;  %s2119_s3 = scalar_lea.hbm %s2671_s0, 16 }
  0x4d   : > { %p2120_p6 = scmp.lt.s32.totalorder %s2113_s18, %s2671_s0  ;;  %p2121_p11 = scmp.lt.s32.totalorder %s2119_s3, %s2114_s24 }
  0x4e   : > { %p2117_p8 = pnand %p2115_p1, %p1996_p9 }
  0x4f   : > { %p2122_p13 = por %p2121_p11, %p2120_p6 }
  0x50   : > { %p2118_p10 = pneg %p2117_p8 }
  0x52   : > { %p2123_p0 = pnand %p2122_p13, %p2118_p10 }
  0x54   : > { %2126 = shalt.err (!%p2123_p0)
}
  0x55   : > { %1831 = dma.hbm_to_vmem [thread:$0]  (!%p2428_p7), %s436_s27, 128, %s438_s26, %s426_s6  }
  0x56   : > { %s471_s11 = scalar_lea.hbm %s2673_s2, %s2426_s15  ;;  %s467_s19 = scalar_lea.vmem [#allocation7], %s2423_s14 }
  0x57   : > { %s473_s21 = sshll.u32 %s471_s11, 4  ;;  %s475_s17 = sshll.u32 %s467_s19, 4  ;;  %s474_s21 = int_to_ptr.hbm [resolvable:$true] %s473_s21  ;;  %s476_s17 = int_to_ptr.vmem [resolvable:$true] %s475_s17 }
  0x58   : > { %s2142_s18 = sshra.s32 %s474_s21, 4  ;;  %s2149_s27 = scalar_lea.hbm %s2673_s2, 16  ;;  %s2143_s18 = int_to_ptr.hbm [resolvable:$true] %s2142_s18 }
  0x59   : > { %s2144_s24 = scalar_lea.hbm %s2143_s18, 8  ;;  %p2150_p10 = scmp.lt.s32.totalorder %s2143_s18, %s2673_s2 }
  0x5a   : > { %p2145_p2 = scmp.ne.s32.totalorder %s2143_s18, %s2144_s24  ;;  %p2151_p6 = scmp.lt.s32.totalorder %s2149_s27, %s2144_s24 }
  0x5c   : > { %p2147_p1 = pnand %p2145_p2, %p1996_p9  ;;  %p2152_p11 = por %p2151_p6, %p2150_p10 }
  0x5e   : > { %p2148_p8 = pneg %p2147_p1 }
  0x60   : > { %p2153_p13 = pnand %p2152_p11, %p2148_p8 }
  0x62   : > { %2156 = shalt.err (!%p2153_p13)
}
  0x63   : > { %1837 = dma.hbm_to_vmem [thread:$0]  (!%p2428_p7), %s474_s21, 128, %s476_s17, %s2438_s16  }
  0x64   : > { %484 = sbr.rel (%p2366_p3) target bundleno = 1658 (0x67a), region = 68  ;;  %s2516_s14 = sand.u32 (!%p2366_p3), 1, %s2246_s22  }
  0x65   : > { %s2519_s15 = sshll.u32 (!%p2366_p3), %s2516_s14, 3  ;;  %s487_s1 = scalar_lea.sflag (!%p2366_p3), [#allocation3], %s2516_s14 }
  0x66   : > { %s490_s25 = scalar_lea.vmem (!%p2366_p3), [#allocation2], %s2519_s15 }
  0x69   : > { %2217 = dma.done.wait (%p2406_p12), %s487_s1, 128  }
  0x6a   : > { %2219 = vsyncadd (%p2406_p12), %s487_s1, 4294967168  ;;  %s496_s29 = sand.u32 1, %s2361_s28   ;;  %s500_s16 = scalar_lea.vmem [#allocation5], %s2519_s15 }
  0x6b   : > { %s497_s20 = scalar_lea.sflag [#allocation6], %s496_s29 }
  0x6c   : > { %2221 = dma.done.wait (%p2406_p12), %s497_s20, 256  }
  0x6d   : > { %2223 = vsyncadd (%p2406_p12), %s497_s20, 4294967040  ;;  %s510_s4 = scalar_lea.vmem [#allocation7], %s2519_s15  ;;  %p2723_p3 = scmp.eq.s32.totalorder %s2361_s28, 0 }
  0x6f   : > { %2225 = dma.done.wait (%p2723_p3), [#allocation9], 640   ;;  %p2724_p7 = pmov %p2723_p3 }
  0x70   : > { %p2725_p9 = pmov %p2723_p3 }
  0x71   : > { %2227 = vsyncadd (%p2724_p7), [#allocation9], 4294966656 }
  0x72   : > { %2229 = dma.done.wait (%p2725_p9), [#allocation12], 1024   ;;  %p2726_p0 = pmov %p2723_p3 }
  0x74   : > { %2231 = vsyncadd (%p2726_p0), [#allocation12], 4294966272  ;;  %p2727_p2 = pmov %p2726_p0 }
  0x75   : > { %p2728_p1 = pmov %p2726_p0 }
  0x76   : > { %2233 = dma.done.wait (%p2727_p2), [#allocation15], 512  }
  0x77   : > { %2235 = vsyncadd (%p2728_p1), [#allocation15], 4294966784  ;;  %v625_v0 = vld [vmem:[#allocation11 + $0x18] sm:$0xff]  ;;  %v624_v1 = vld [vmem:[#allocation11 + $0x10] sm:$0xff]  ;;  %vm598_vm0 = vcmask 261120   ;;  %s2263_s11 = smov 104  }
  0x78   : > { %645 = vmatpush.msra.mxu1 %v625_v0  ;;  %v593_v2 = vld [vmem:[#allocation10 + $0x18] sm:$0xff]  ;;  %v623_v3 = vld [vmem:[#allocation11 + $0x8] sm:$0xff]  ;;  %v592_v4 = vld [vmem:[#allocation10 + $0x10] sm:$0xff]  ;;  %s2264_s21 = smov 120   ;;  %s2265_s19 = smov 112   ;;  %vm839_vm1 = vcmask 64512  }
  0x79   : > { %614 = vmatpush.msra.mxu0 %v593_v2  ;;  %v622_v5 = vld [vmem:[#allocation11] sm:$0xff]  ;;  %v591_v6 = vld [vmem:[#allocation10 + $0x8] sm:$0xff]  ;;  %v2266_v28 = vmov 2.828427   ;;  %v939_v34 = vld [vmem:[#allocation8] sm:$0xff]  ;;  %s2269_s3 = smov 16  }
  0x7a   : > { %646 = vmatpush.msra.mxu1 %v624_v1  ;;  %v588_v7 = vld [vmem:[%s500_s16] sm:$0xff]  ;;  %v587_v9 = vld [vmem:[%s490_s25] sm:$0xff]  ;;  %1914 = vrcp.f32 %v2266_v28  ;;  %vm940_vm3 = vcmp.eq.s32.totalorder %v939_v34, 0  ;;  %s2270_s27 = smov 24   ;;  %s2271_s26 = smov 8  }
  0x7b   : > { %615 = vmatpush.msra.mxu0 %v592_v4  ;;  %v590_v8 = vld [vmem:[#allocation10] sm:$0xff]  ;;  %v1910_v10 = vld [vmem:[%s2678_s7] ss:$0 sm:$0xff]  ;;  %v656_v40 = vld [vmem:[#allocation13 + $0x18] sm:$0xff]  ;;  %s1781_s6 = sshll.u32 %s2361_s28, 3  ;;  %s2729_s29 = sld [smem:[#allocation34_spill]] }
  0x7c   : > { %647 = vmatpush.msra.mxu1 %v623_v3  ;;  %v1911_v13 = vld [vmem:[%s2676_s5] ss:$0 sm:$0xff]  ;;  %v655_v41 = vld [vmem:[#allocation13 + $0x10] sm:$0xff]  ;;  %676 = vmatpush.msra.mxu2 %v656_v40  ;;  %v653_v43 = vld [vmem:[#allocation13] sm:$0xff]  ;;  %s2731_s30 = sld [smem:[#allocation33_spill]]  ;;  %s1564_s17 = scalar_lea.sflag [#allocation4], %s2516_s14 }
  0x7d   : > { %616 = vmatpush.msra.mxu0 %v591_v6  ;;  %v654_v42 = vld [vmem:[#allocation13 + $0x8] sm:$0xff] }
  0x7e   : > { %648 = vmatpush.msra.mxu1 %v622_v5  ;;  %677 = vmatpush.msra.mxu2 %v655_v41  ;;  %v589_v44 = vld [vmem:[%s510_s4] sm:$0xff] }
  0x7f   : > { %1765 = vmatmul.msk.f32.vlgmr.msra.gmra.mxu1 %vm598_vm0, %v588_v7  ;;  %617 = vmatpush.msra.mxu0 %v590_v8 }
  0x80   : > { %1764 = vmatmul.msk.f32.vlgmr.msra.gmra.mxu0 %vm598_vm0, %v587_v9  ;;  %v1915_v29 = vpop.eup %1914  ;;  %678 = vmatpush.msra.mxu2 %v654_v42 }
  0x81   : > { %v929_v30 = vmul.f32 2.828427, %v1915_v29  ;;  %vm933_vm2 = vweird.f32 %v1915_v29  ;;  %s1574_s16 = scalar_lea.hbm %s2729_s29, %s1781_s6 }
  0x82   : > { %679 = vmatpush.msra.mxu2 %v653_v43 }
  0x83   : > { %v930_v31 = vsub.f32 1.0, %v929_v30  ;;  %1766 = vmatmul.msk.f32.vlgmr.msra.gmra.mxu2 %vm598_vm0, %v589_v44 }
  0x85   : > { %v931_v32 = vmul.f32 %v1915_v29, %v930_v31 }
  0x87   : > { %v932_v33 = vadd.f32 %v1915_v29, %v931_v32 }
  0x89   : > { %v934_v35 = vsel %vm933_vm2, %v1915_v29, %v932_v33 }
  0xfc   : > { %v650_v11 = vpop.f32.mrf.mxu1 }
  0xfd   : > { %v651_v12 = vadd.f32 %v1910_v10, %v650_v11  ;;  %v619_v14 = vpop.f32.mrf.mxu0 }
  0xfe   : > { %v620_v15 = vadd.f32 %v1911_v13, %v619_v14  ;;  %v1912_v13 = vld [vmem:[%s2680_s9] ss:$0 sm:$0xff] }
  0xff   : > { %698 = vrot.lane.b32.xlu1 %v651_v12, %s2263_s11  ;;  %692 = vrot.lane.b32.xlu0 %v651_v12, %s2264_s21 }
 0x100   : > { %687 = vrot.lane.b32.xlu2 %v620_v15, %s2265_s19 }
 0x106   : > { %v681_v14 = vpop.f32.mrf.mxu2 }
 0x107   : > { %695 = vrot.lane.b32.xlu0 %v651_v12, %s2265_s19  ;;  %685 = vrot.lane.b32.xlu1 %v620_v15, %s2264_s21 }
 0x108   : > { %689 = vrot.lane.b32.xlu2 %v620_v15, %s2263_s11 }
 0x129   : > { %711 = vxpose.xlu0.b32.start.end [1/1] (short) (narrow) %v651_v12, 8 }
 0x15a   : > { %v688_v21 = vpop.permute.xlu2 %687 }
 0x162   : > { %v690_v22 = vpop.permute.xlu2 %689 }
 0x171   : > { %v693_v16 = vpop.permute.xlu0 %692  ;;  %v699_v17 = vpop.permute.xlu1 %698 }
 0x172   : > { %743 = vxpose.xlu1.b32.start.end [1/1] (short) (narrow) %v693_v16, 8 }
 0x179   : > { %v696_v18 = vpop.permute.xlu0 %695  ;;  %v686_v23 = vpop.permute.xlu1 %685 }
 0x17a   : > { %v1903_v19 = vpack.i.bf16 %v699_v17, %v696_v18 }
 0x17c   : > { %1904 = vxpose.xlu2.b32.start.end [1/1] (short) (narrow) %v1903_v19, 8 }
 0x1cd   : > { %v727_v20 = vpop.trf.xlu0 }
 0x1ce   : > { %857 = vmatpush.msra.mxu3 %v727_v20 }
 0x1cf   : > { %1767 = vmatmul.msk.f32.vlgmr.msra.gmra.mxu3 %vm839_vm1, %v620_v15  ;;  %v682_v15 = vadd.f32 %v1912_v13, %v681_v14 }
 0x215   : > { %v1905_v24 = vpop.trf.xlu2 }
 0x216   : > { %v759_v25 = vpop.trf.xlu1  ;;  %v1906_v26 = vunpack.i.l.bf16 %v1905_v24  ;;  %v1909_v27 = vunpack.i.h.bf16 %v1905_v24 }
 0x217   : > { %879 = vmatpush.msrb.mxu3 %v759_v25 }
 0x218   : > { %1768 = vmatmul.msk.f32.vlgmr.msrb.gmra.mxu3 %vm839_vm1, %v686_v23  ;;  %901 = vmatpush.msrb.mxu0 %v1906_v26 }
 0x219   : > { %923 = vmatpush.msrb.mxu1 %v1909_v27  ;;  %1769 = vmatmul.msk.f32.vlgmr.msrb.gmra.mxu0 %vm839_vm1, %v688_v21 }
 0x21a   : > { %1770 = vmatmul.msk.f32.vlgmr.msrb.gmra.mxu1 %vm839_vm1, %v690_v22 }
 0x252   : > { %v859_v36 = vpop.f32.mrf.mxu3 }
 0x253   : > { %v935_v37 = vmul.f32 %v934_v35, %v859_v36 }
 0x255   : > { %v943_v38 = vsel %vm940_vm3, -1e+09, %v935_v37 }
 0x256   : > { %v947_v39 = vsel %vm839_vm1, %v943_v38, -inf }
 0x257   : > { %948 = vmax.xlane.f32.xlu0 %v947_v39 }
 0x296   : > { %v903_v45 = vpop.f32.mrf.mxu0 }
 0x297   : > { %v937_v46 = vmul.f32 %v934_v35, %v903_v45  ;;  %v925_v47 = vpop.f32.mrf.mxu1 }
 0x298   : > { %v938_v48 = vmul.f32 %v934_v35, %v925_v47 }
 0x299   : > { %v945_v49 = vsel %vm940_vm3, -1e+09, %v937_v46 }
 0x29a   : > { %v953_v50 = vsel %vm839_vm1, %v945_v49, -inf  ;;  %v946_v51 = vsel %vm940_vm3, -1e+09, %v938_v48 }
 0x29b   : > { %954 = vmax.xlane.f32.xlu1 %v953_v50  ;;  %v956_v52 = vsel %vm839_vm1, %v946_v51, -inf  ;;  %v881_v53 = vpop.f32.mrf.mxu3 }
 0x29c   : > { %957 = vmax.xlane.f32.xlu0 %v956_v52  ;;  %v936_v54 = vmul.f32 %v934_v35, %v881_v53 }
 0x29e   : > { %v944_v55 = vsel %vm940_vm3, -1e+09, %v936_v54 }
 0x29f   : > { %v950_v56 = vsel %vm839_vm1, %v944_v55, -inf }
 0x2a0   : > { %951 = vmax.xlane.f32.xlu2 %v950_v56 }
 0x2ca   : > { %v949_v57 = vpop.xlane.xlu0 %948 }
 0x2cb   : > { %v959_v58 = vsub.f32 %v943_v38, %v949_v57 }
 0x2cd   : > { %v963_v59 = vmul.f32 1.442695, %v959_v58 }
 0x2cf   : > { %1916 = vpow2.f32 %v963_v59 }
 0x2d5   : > { %v1917_v60 = vpop.eup %1916 }
 0x2d6   : > { %v971_v61 = vsel %vm839_vm1, %v1917_v60, 0.0 }
 0x2d7   : > { %972 = vadd.xlane.f32.xlu1 %v971_v61 }
 0x30e   : > { %v955_v62 = vpop.xlane.xlu1 %954 }
 0x30f   : > { %v961_v63 = vsub.f32 %v945_v49, %v955_v62  ;;  %v958_v0 = vpop.xlane.xlu0 %957 }
 0x310   : > { %v962_v1 = vsub.f32 %v946_v51, %v958_v0 }
 0x311   : > { %v967_v2 = vmul.f32 1.442695, %v961_v63 }
 0x312   : > { %v969_v3 = vmul.f32 1.442695, %v962_v1 }
 0x313   : > { %1918 = vpow2.f32 %v967_v2  ;;  %v952_v4 = vpop.xlane.xlu2 %951 }
 0x314   : > { %1920 = vpow2.f32 %v969_v3  ;;  %v960_v5 = vsub.f32 %v944_v55, %v952_v4 }
 0x316   : > { %v965_v6 = vmul.f32 1.442695, %v960_v5 }
 0x318   : > { %1922 = vpow2.f32 %v965_v6 }
 0x319   : > { %v2578_v7 = vpop.eup %1918 }
 0x31a   : > { %v2580_v8 = vpop.eup %1920  ;;  %v977_v9 = vsel %vm839_vm1, %v2578_v7, 0.0 }
 0x31b   : > { %978 = vadd.xlane.f32.xlu0 %v977_v9  ;;  %v980_v10 = vsel %vm839_vm1, %v2580_v8, 0.0 }
 0x31c   : > { %981 = vadd.xlane.f32.xlu1 %v980_v10 }
 0x31e   : > { %v2586_v11 = vpop.eup %1922 }
 0x31f   : > { %v974_v12 = vsel %vm839_vm1, %v2586_v11, 0.0 }
 0x320   : > { %975 = vadd.xlane.f32.xlu2 %v974_v12  ;;  %v2267_v12 = vmov 1983009808  }
 0x321   : > { %v1409_v13 = vunpack.c.l.s4 %v2267_v12 }
 0x32f   : > { %705 = vrot.lane.b32.xlu0 %v682_v15, %s2265_s19  ;;  %s1578_s19 = sshll.u32 %s1574_s16, 4  ;;  %s1579_s19 = int_to_ptr.hbm [resolvable:$true] %s1578_s19 }
 0x330   : > { %s2186_s28 = sshra.s32 %s1579_s19, 4  ;;  %s2187_s28 = int_to_ptr.hbm [resolvable:$true] %s2186_s28 }
 0x331   : > { %s2188_s18 = scalar_lea.hbm %s2187_s28, 8  ;;  %p2193_p6 = scmp.lt.s32.totalorder %s2187_s28, %s2729_s29 }
 0x332   : > { %p2189_p12 = scmp.ne.s32.totalorder %s2187_s28, %s2188_s18 }
 0x334   : > { %p2190_p8 = pnand %p2189_p12, %p2413_p5 }
 0x335   : > { %708 = vrot.lane.b32.xlu1 %v682_v15, %s2263_s11  ;;  %s586_s11 = scalar_lea.vmem [#allocation16], %s2519_s15  ;;  %s2192_s15 = scalar_lea.hbm %s2729_s29, 16 }
 0x336   : > { %p2191_p10 = pneg %p2190_p8  ;;  %p2194_p11 = scmp.lt.s32.totalorder %s2192_s15, %s2188_s18 }
 0x338   : > { %702 = vrot.lane.b32.xlu2 %v682_v15, %s2264_s21  ;;  %s1576_s21 = sshll.u32 %s586_s11, 4  ;;  %p2195_p13 = por %p2194_p11, %p2193_p6  ;;  %s1577_s21 = int_to_ptr.vmem [resolvable:$true] %s1576_s21 }
 0x33a   : > { %p2196_p3 = pnand %p2195_p13, %p2191_p10 }
 0x34a   : > { %v973_v16 = vpop.xlane.xlu1 %972 }
 0x34b   : > { %1924 = vrcp.f32 %v973_v16  ;;  %v994_v20 = vand.u32 2147483648, %v973_v16  ;;  %v992_v22 = vand.u32 2147483647, %v973_v16  ;;  %vm988_vm5 = vweird.f32 %v973_v16 }
 0x34d   : > { %v995_v24 = vor.u32 1.1754944e-38, %v994_v20  ;;  %vm993_vm7 = vcmp.eq.f32.partialorder %v992_v22, 8.507059e+37  ;;  %v2268_v22 = vmov 1934713408  }
 0x351   : > { %v1925_v17 = vpop.eup %1924  ;;  %1043 = vxpose.xlu0.b32.start.end [1/1] (short) (narrow) %v682_v15, 8 }
 0x352   : > { %v984_v18 = vmul.f32 %v1925_v17, %v973_v16  ;;  %vm989_vm4 = vweird.f32 %v1925_v17 }
 0x353   : > { %vm990_vm6 = vmor %vm988_vm5, %vm989_vm4 }
 0x354   : > { %v985_v19 = vsub.f32 1.0, %v984_v18 }
 0x356   : > { %v986_v21 = vmul.f32 %v1925_v17, %v985_v19 }
 0x358   : > { %v987_v23 = vadd.f32 %v1925_v17, %v986_v21 }
 0x35a   : > { %v991_v25 = vsel %vm990_vm6, %v1925_v17, %v987_v23  ;;  %vm1404_vm6 = vcmask 1047556   ;;  %v1410_v17 = vunpack.c.0.s8 %v1409_v13  ;;  %v1433_v23 = vunpack.c.l.s4 %v2268_v22  ;;  %v1531_v22 = vld [vmem:[#allocation14] sm:$0xff] }
 0x35b   : > { %v996_v26 = vsel %vm993_vm7, %v995_v24, %v991_v25  ;;  %vm1527_vm7 = vcmask 130048  }
 0x35c   : > { %v997_v27 = vmul.f32 %v1917_v60, %v996_v26 }
 0x35e   : > { %1771 = vmatpush.xpose.msk.msrb.mxu2 %vm839_vm1, %v997_v27  ;;  %v1434_v27 = vunpack.c.0.s8 %v1433_v23 }
 0x38e   : > { %v979_v28 = vpop.xlane.xlu0 %978 }
 0x38f   : > { %v982_v29 = vpop.xlane.xlu1 %981  ;;  %1926 = vrcp.f32 %v979_v28  ;;  %v1022_v36 = vand.u32 2147483647, %v979_v28  ;;  %v1024_v39 = vand.u32 2147483648, %v979_v28  ;;  %vm1018_vm11 = vweird.f32 %v979_v28 }
 0x390   : > { %1928 = vrcp.f32 %v982_v29  ;;  %v1037_v38 = vand.u32 2147483647, %v982_v29  ;;  %v1039_v41 = vand.u32 2147483648, %v982_v29  ;;  %vm1033_vm10 = vweird.f32 %v982_v29 }
 0x391   : > { %vm1023_vm12 = vcmp.eq.f32.partialorder %v1022_v36, 8.507059e+37  ;;  %v1025_v48 = vor.u32 1.1754944e-38, %v1024_v39 }
 0x392   : > { %vm1038_vm13 = vcmp.eq.f32.partialorder %v1037_v38, 8.507059e+37  ;;  %v1040_v50 = vor.u32 1.1754944e-38, %v1039_v41 }
 0x393   : > { %v976_v30 = vpop.xlane.xlu2 %975 }
 0x394   : > { %1930 = vrcp.f32 %v976_v30  ;;  %v1007_v52 = vand.u32 2147483647, %v976_v30  ;;  %v1009_v53 = vand.u32 2147483648, %v976_v30  ;;  %vm1003_vm3 = vweird.f32 %v976_v30 }
 0x395   : > { %v1927_v31 = vpop.eup %1926 }
 0x396   : > { %v1929_v32 = vpop.eup %1928  ;;  %v1014_v33 = vmul.f32 %v1927_v31, %v979_v28  ;;  %vm1019_vm8 = vweird.f32 %v1927_v31  ;;  %v1010_v62 = vor.u32 1.1754944e-38, %v1009_v53  ;;  %vm1008_vm5 = vcmp.eq.f32.partialorder %v1007_v52, 8.507059e+37 }
 0x397   : > { %v1029_v34 = vmul.f32 %v1929_v32, %v982_v29  ;;  %vm1034_vm9 = vweird.f32 %v1929_v32  ;;  %vm1020_vm14 = vmor %vm1018_vm11, %vm1019_vm8  ;;  %vm1529_vm8 = vcmask 195584  }
 0x398   : > { %v1015_v35 = vsub.f32 1.0, %v1014_v33  ;;  %vm1035_vm15 = vmor %vm1033_vm10, %vm1034_vm9 }
 0x399   : > { %v1030_v37 = vsub.f32 1.0, %v1029_v34 }
 0x39a   : > { %v1931_v40 = vpop.eup %1930  ;;  %v1016_v42 = vmul.f32 %v1927_v31, %v1015_v35 }
 0x39b   : > { %v1031_v43 = vmul.f32 %v1929_v32, %v1030_v37  ;;  %v999_v44 = vmul.f32 %v1931_v40, %v976_v30  ;;  %v703_v45 = vpop.permute.xlu2 %702  ;;  %vm1004_vm2 = vweird.f32 %v1931_v40 }
 0x39c   : > { %v1017_v46 = vadd.f32 %v1927_v31, %v1016_v42  ;;  %1075 = vxpose.xlu2.b32.start.end [1/1] (short) (narrow) %v703_v45, 8  ;;  %vm1005_vm4 = vmor %vm1003_vm3, %vm1004_vm2 }
 0x39d   : > { %v1032_v47 = vadd.f32 %v1929_v32, %v1031_v43  ;;  %v1000_v49 = vsub.f32 1.0, %v999_v44 }
 0x39e   : > { %v1021_v51 = vsel %vm1020_vm14, %v1927_v31, %v1017_v46 }
 0x39f   : > { %v1036_v54 = vsel %vm1035_vm15, %v1929_v32, %v1032_v47  ;;  %v1026_v55 = vsel %vm1023_vm12, %v1025_v48, %v1021_v51  ;;  %v1001_v56 = vmul.f32 %v1931_v40, %v1000_v49 }
 0x3a0   : > { %v1041_v57 = vsel %vm1038_vm13, %v1040_v50, %v1036_v54  ;;  %v1027_v58 = vmul.f32 %v2578_v7, %v1026_v55 }
 0x3a1   : > { %v1002_v59 = vadd.f32 %v1931_v40, %v1001_v56  ;;  %v706_v60 = vpop.permute.xlu0 %705  ;;  %v1042_v61 = vmul.f32 %v2580_v8, %v1041_v57 }
 0x3a2   : > { %1775 = vmatpush.xpose.msk.msra.mxu0 %vm839_vm1, %v1027_v58  ;;  %1107 = vxpose.xlu1.b32.start.end [1/1] (short) (narrow) %v706_v60, 8 }
 0x3a3   : > { %v1006_v63 = vsel %vm1005_vm4, %v1931_v40, %v1002_v59  ;;  %1777 = vmatpush.xpose.msk.msra.mxu1 %vm839_vm1, %v1042_v61 }
 0x3a4   : > { %v1011_v0 = vsel %vm1008_vm5, %v1010_v62, %v1006_v63 }
 0x3a5   : > { %v1012_v1 = vmul.f32 %v2586_v11, %v1011_v0 }
 0x3a7   : > { %1773 = vmatpush.xpose.msk.msra.mxu3 %vm839_vm1, %v1012_v1  ;;  %v709_v2 = vpop.permute.xlu1 %708 }
 0x3a8   : > { %1139 = vxpose.xlu0.b32.start.end [1/1] (short) (narrow) %v709_v2, 8 }
 0x3f5   : > { %v1059_v3 = vpop.trf.xlu0 }
 0x3f6   : > { %1772 = vmatmul.msk.f32.vlgmr.msrb.gmra.mxu2 %vm839_vm1, %v1059_v3 }
 0x435   : > { %v1091_v4 = vpop.trf.xlu2 }
 0x436   : > { %1774 = vmatmul.msk.f32.vlgmr.msra.gmra.mxu3 %vm839_vm1, %v1091_v4 }
 0x446   : > { %v1123_v5 = vpop.trf.xlu1 }
 0x447   : > { %1776 = vmatmul.msk.f32.vlgmr.msra.gmra.mxu0 %vm839_vm1, %v1123_v5 }
 0x44c   : > { %v1155_v6 = vpop.trf.xlu0 }
 0x44d   : > { %1778 = vmatmul.msk.f32.vlgmr.msra.gmra.mxu1 %vm839_vm1, %v1155_v6 }
 0x479   : > { %v1194_v7 = vpop.f32.mrf.mxu2 }
 0x47a   : > { %1275 = vxpose.xlu0.b32.start.end [1/1] (short) (narrow) %v1194_v7, 8 }
 0x4b9   : > { %v1220_v8 = vpop.f32.mrf.mxu3 }
 0x4ba   : > { %1307 = vxpose.xlu0.b32.start.end [1/1] (short) (narrow) %v1220_v8, 8 }
 0x4c4   : > { %v1246_v9 = vpop.f32.mrf.mxu0 }
 0x4c5   : > { %1339 = vxpose.xlu2.b32.start.end [1/1] (short) (narrow) %v1246_v9, 8 }
 0x4ca   : > { %v1272_v10 = vpop.f32.mrf.mxu1 }
 0x4cd   : > { %1371 = vxpose.xlu2.b32.start.end [1/1] (short) (narrow) %v1272_v10, 8 }
 0x51e   : > { %v1291_v11 = vpop.trf.xlu0 }
 0x51f   : > { %v1406_v14 = vrot.slane %v1291_v11, 4 }
 0x55e   : > { %v1355_v15 = vpop.trf.xlu2  ;;  %v1323_v18 = vpop.trf.xlu0 }
 0x55f   : > { %v1403_v16 = vrot.slane %v1355_v15, 4  ;;  %v1407_v19 = vsel %vm1404_vm6, %v1355_v15, %v1406_v14  ;;  %v1418_v21 = vrot.slane %v1323_v18, 4 }
 0x560   : > { %v1415_v24 = vperm.slane %v1407_v19, %v1410_v17  ;;  %v1534_v19 = vld [vmem:[#allocation14 + $0x18] sm:$0xff] }
 0x561   : > { %v1405_v20 = vsel %vm1404_vm6, %v1403_v16, %v1291_v11  ;;  %1554 = vmatpush.msra.mxu2 %v1534_v19 }
 0x562   : > { %v1411_v25 = vperm.slane %v1405_v20, %v1410_v17  ;;  %v1442_v30 = vrot.slane %v1415_v24, 4  ;;  %v1533_v20 = vld [vmem:[#allocation14 + $0x10] sm:$0xff] }
 0x563   : > { %1555 = vmatpush.msra.mxu2 %v1533_v20 }
 0x564   : > { %v1430_v33 = vrot.slane %v1411_v25, 4 }
 0x566   : > { %v1387_v26 = vpop.trf.xlu2 }
 0x567   : > { %v1416_v28 = vrot.slane %v1387_v26, 4  ;;  %v1419_v29 = vsel %vm1404_vm6, %v1387_v26, %v1418_v21  ;;  %v1532_v21 = vld [vmem:[#allocation14 + $0x8] sm:$0xff] }
 0x568   : > { %v1427_v31 = vperm.slane %v1419_v29, %v1410_v17  ;;  %1556 = vmatpush.msra.mxu2 %v1532_v21  ;;  %v1913_v29 = vld [vmem:[%s2731_s30] ss:$0 sm:$0xff] }
 0x569   : > { %v1417_v32 = vsel %vm1404_vm6, %v1416_v28, %v1323_v18 }
 0x56a   : > { %v1423_v34 = vperm.slane %v1417_v32, %v1410_v17  ;;  %v1440_v35 = vrot.slane %v1427_v31, 4  ;;  %v1443_v36 = vsel %vm1404_vm6, %v1427_v31, %v1442_v30  ;;  %1557 = vmatpush.msra.mxu2 %v1531_v22 }
 0x56b   : > { %v1451_v37 = vperm.slane %v1443_v36, %v1434_v27 }
 0x56c   : > { %v1428_v38 = vrot.slane %v1423_v34, 4  ;;  %v1431_v39 = vsel %vm1404_vm6, %v1423_v34, %v1430_v33  ;;  %v1441_v40 = vsel %vm1404_vm6, %v1440_v35, %v1415_v24 }
 0x56d   : > { %v1439_v41 = vperm.slane %v1431_v39, %v1434_v27  ;;  %v1447_v42 = vperm.slane %v1441_v40, %v1434_v27  ;;  %v1458_v43 = vrot.slane %v1451_v37, 4 }
 0x56e   : > { %v1429_v44 = vsel %vm1404_vm6, %v1428_v38, %v1411_v25 }
 0x56f   : > { %v1435_v45 = vperm.slane %v1429_v44, %v1434_v27  ;;  %v1454_v46 = vrot.slane %v1439_v41, 4  ;;  %v1456_v47 = vrot.slane %v1447_v42, 4  ;;  %v1459_v48 = vsel %vm1404_vm6, 0.0, %v1458_v43 }
 0x570   : > { %v1471_v49 = vsel %vm1404_vm6, %v1458_v43, %v1447_v42  ;;  %v1476_v50 = vrot.slane %v1459_v48, 4 }
 0x571   : > { %v1452_v51 = vrot.slane %v1435_v45, 4  ;;  %v1455_v52 = vsel %vm1404_vm6, 0.0, %v1454_v46  ;;  %v1457_v53 = vsel %vm1404_vm6, 0.0, %v1456_v47  ;;  %v1475_v54 = vperm.slane %v1471_v49, %v1410_v17 }
 0x572   : > { %v1465_v55 = vrot.slane %v1455_v52, 4  ;;  %v1460_v56 = vsel %vm1404_vm6, %v1454_v46, %v1435_v45  ;;  %v1477_v57 = vsel %vm1404_vm6, %v1476_v50, %v1457_v53 }
 0x573   : > { %v1453_v58 = vsel %vm1404_vm6, 0.0, %v1452_v51  ;;  %v1464_v59 = vperm.slane %v1460_v56, %v1410_v17  ;;  %v1481_v60 = vperm.slane %v1477_v57, %v1410_v17  ;;  %v1496_v61 = vrot.slane %v1475_v54, 4 }
 0x574   : > { %v1466_v62 = vsel %vm1404_vm6, %v1465_v55, %v1453_v58 }
 0x575   : > { %v1470_v63 = vperm.slane %v1466_v62, %v1410_v17  ;;  %v1484_v0 = vrot.slane %v1464_v59, 4  ;;  %v1497_v1 = vsel %vm1404_vm6, %v1481_v60, %v1496_v61  ;;  %v1494_v2 = vrot.slane %v1481_v60, 4 }
 0x576   : > { %v1505_v3 = vperm.slane %v1497_v1, %v1434_v27 }
 0x577   : > { %v1485_v4 = vsel %vm1404_vm6, %v1470_v63, %v1484_v0  ;;  %v1482_v5 = vrot.slane %v1470_v63, 4  ;;  %v1495_v6 = vsel %vm1404_vm6, %v1494_v2, %v1475_v54 }
 0x578   : > { %v1493_v7 = vperm.slane %v1485_v4, %v1434_v27  ;;  %v1510_v8 = vrot.slane %v1505_v3, 4  ;;  %v1501_v9 = vperm.slane %v1495_v6, %v1434_v27 }
 0x579   : > { %v1483_v10 = vsel %vm1404_vm6, %v1482_v5, %v1464_v59 }
 0x57a   : > { %v1511_v11 = vsel %vm1404_vm6, %v1510_v8, %v1493_v7  ;;  %v1512_v12 = vrot.slane %v1493_v7, 4  ;;  %v1489_v13 = vperm.slane %v1483_v10, %v1434_v27  ;;  %v1506_v14 = vrot.slane %v1501_v9, 4 }
 0x57b   : > { %1519 = vrot.lane.b32.xlu0 %v1511_v11, %s2269_s3 }
 0x57c   : > { %v1513_v15 = vsel %vm1404_vm6, %v1505_v3, %v1512_v12  ;;  %v1508_v16 = vrot.slane %v1489_v13, 4  ;;  %v1507_v17 = vsel %vm1404_vm6, %v1506_v14, %v1489_v13 }
 0x57d   : > { %1523 = vrot.lane.b32.xlu1 %v1513_v15, %s2270_s27 }
 0x57e   : > { %v1509_v18 = vsel %vm1404_vm6, %v1501_v9, %v1508_v16 }
 0x57f   : > { %1515 = vrot.lane.b32.xlu2 %v1509_v18, %s2271_s26 }
 0x5d9   : > { %v1516_v23 = vpop.permute.xlu2 %1515 }
 0x5da   : > { %v1526_v24 = vsel %vm839_vm1, %v1507_v17, %v1516_v23 }
 0x5ed   : > { %v1520_v25 = vpop.permute.xlu0 %1519 }
 0x5ee   : > { %v1528_v26 = vsel %vm1527_vm7, %v1526_v24, %v1520_v25 }
 0x5ef   : > { %v1524_v27 = vpop.permute.xlu1 %1523 }
 0x5f0   : > { %v1530_v28 = vsel %vm1529_vm8, %v1528_v26, %v1524_v27 }
 0x5f1   : > { %1779 = vmatmul.msk.f32.vlgmr.msra.gmra.mxu2 %vm598_vm0, %v1530_v28 }
 0x674   : > { %v1559_v30 = vpop.f32.mrf.mxu2 }
 0x675   : > { %v1560_v31 = vadd.f32 %v1913_v29, %v1559_v30 }
 0x677   : > { %1562 = vst.msk [vmem:[%s586_s11] sm:$0xff] %vm598_vm0, %v1560_v31 }
 0x678   : > { %2199 = shalt.err (!%p2196_p3)
}
 0x679   : > { %1810 = dma.vmem_to_hbm [thread:$0]  (%p2413_p5), %s1577_s21, 128, %s1579_s19, %s1564_s17  }
 0x67a PF: > { %s2732_s14 = sld [smem:[#allocation23_spill]] }
 0x67b   : > { %s2734_s6 = sld [smem:[#allocation24_spill]] }
 0x680   : > { %s1590_s1 = sand.u32 1, %s2732_s14  }
 0x681   : > { %p2735_p7 = scmp.ge.s32.totalorder %s2734_s6, 2  ;;  %s1591_s25 = scalar_lea.sflag [#allocation4], %s1590_s1 }
 0x683   : > { %p1839_p9 = pnand %p2735_p7, %p2417_p4 }
 0x685   : > { %p1840_p0 = pneg %p1839_p9 }
 0x687   : > { %2237 = dma.done.wait (%p1840_p0), %s1591_s25, 128  }
 0x688   : > { %2239 = vsyncadd (%p1840_p0), %s1591_s25, 4294967168  ;;  %s2736_s24 = sld [smem:[#allocation25_spill]]  ;;  %s2738_s21 = smov %s2246_s22 }
 0x689   : > { %s2737_s16 = sld [smem:[#allocation26_spill]]  ;;  %s2739_s22 = smov %s2250_s23 }
 0x68e   : > { %p31_p2 = scmp.ge.s32.totalorder %s2736_s24, 4  }
 0x68f   : > { %s2740_s23 = smov %s2737_s16 }
 0x690   :  { %33 = sbr.rel (!%p31_p2) target bundleno = 17 (0x11), region = 157 }
 0x695   :  { %1597 = vsyncpa [#allocation3], 1 }
 0x696   :  { %1599 = vsyncpa [#allocation3 + $0x1], 1 }
 0x697   :  { %1600 = vsyncpa [#allocation6], 1 }
 0x698   :  { %1602 = vsyncpa [#allocation6 + $0x1], 1 }
 0x699   :  { %1603 = vsyncpa [#allocation9], 1 }
 0x69a   :  { %1604 = vsyncpa [#allocation12], 1 }
 0x69b   :  { %1605 = vsyncpa [#allocation15], 1 }
 0x69c   :  { %1606 = vsyncpa [#allocation4], 1 }
 0x69d   :  { %1608 = vsyncpa [#allocation4 + $0x1], 1 }

</bundles_post_ra>
